<compile_context>
chip_gen: v7x
topology: tpu7x:2x2x1
jax: 0.10.0
libtpu: 0.0.40
codegen_flags: <defaults>
</compile_context>

<pallas_src>
import jax
import jax.numpy as jnp
from jax.experimental import pallas as pl
from jax.experimental.pallas import tpu as pltpu

IN_FEATURES = 25
OUT_FEATURES = 16

FAST_PATH_MAX = 256   # below this row count, fused XLA beats kernel dispatch overhead
MAX_TB = 2048         # rows per batch tile (multiple of 8); ~6 MiB VMEM double-buffered,
                      # fits the default scoped VMEM on v5e/v6e/v7x with no flags


def _linear_add_relu_kernel(x1_ref, w_ref, b_ref, x2_ref, o_ref):
    # relu(x1 @ W + b + x2) on one batch tile; MXU matmul with f32 accumulation.
    v1 = jnp.dot(x1_ref[...], w_ref[...], preferred_element_type=jnp.float32)
    v2 = v1 + b_ref[...] + x2_ref[...].astype(jnp.float32)   # safe if x2 is bf16 (v5e VPU)
    o_ref[...] = jnp.maximum(v2, 0.0).astype(o_ref.dtype)


def _round_up(x, m):
    return ((x + m - 1) // m) * m


def _choose_tile(batch):
    # At least 2 tiles (even split across v7x's 2 TensorCores), each <= MAX_TB rows,
    # tile height a multiple of 8 sublanes.
    n_tiles = max(2, pl.cdiv(batch, MAX_TB))
    if n_tiles % 2:
        n_tiles += 1
    tb = _round_up(pl.cdiv(batch, n_tiles), 8)
    n_tiles = pl.cdiv(batch, tb)
    return tb, n_tiles


def linear_add_relu(x1, w, b, x2, *, use_pallas=None):
    """relu(x1 @ w + b + x2); x1:(B,25), w:(25,16), b:(16,), x2:(B,16)."""
    batch = x1.shape[0]
    if use_pallas is None:
        use_pallas = batch > FAST_PATH_MAX
    if not use_pallas:
        # Small-batch fast path: one fused XLA pass; at B~1 the pallas_call
        # dispatch alone costs more than the whole op.
        return jnp.maximum(x1 @ w + b[None, :] + x2, 0.0)

    tb, n_tiles = _choose_tile(batch)
    b2d = b.reshape(1, OUT_FEATURES)

    # No padding anywhere: feature dims (25 / 16) are full array extents, so the
    # BlockSpecs are legal and carry only useful bytes. The ragged batch tail is a
    # partial final block; its out-of-bounds rows are never written back.
    return pl.pallas_call(
        _linear_add_relu_kernel,
        out_shape=jax.ShapeDtypeStruct((batch, OUT_FEATURES), x1.dtype),
        grid_spec=pltpu.PrefetchScalarGridSpec(
            num_scalar_prefetch=0,
            grid=(n_tiles,),
            in_specs=[
                pl.BlockSpec((tb, IN_FEATURES), lambda i: (i, 0)),           # x1 tile
                pl.BlockSpec((IN_FEATURES, OUT_FEATURES), lambda i: (0, 0)), # W (resident)
                pl.BlockSpec((1, OUT_FEATURES), lambda i: (0, 0)),           # bias
                pl.BlockSpec((tb, OUT_FEATURES), lambda i: (i, 0)),          # x2 tile
            ],
            out_specs=pl.BlockSpec((tb, OUT_FEATURES), lambda i: (i, 0)),
        ),
        compiler_params=pltpu.CompilerParams(
            dimension_semantics=("parallel",)),   # megacore sharding on v7x
    )(x1, w, b2d, x2)


if __name__ == "__main__":
    key = jax.random.PRNGKey(0)
    k_x1, k_x2, k_w, k_b, k_b1, k_b2 = jax.random.split(key, 6)

    # Deterministic Linear(25, 16) params, PyTorch-style uniform(-1/sqrt(in), 1/sqrt(in))
    bound = 1.0 / (IN_FEATURES ** 0.5)
    w = jax.random.uniform(k_w, (IN_FEATURES, OUT_FEATURES),
                           minval=-bound, maxval=bound, dtype=jnp.float32)
    b = jax.random.uniform(k_b, (OUT_FEATURES,),
                           minval=-bound, maxval=bound, dtype=jnp.float32)

    def ref_fn(a1, a2):
        return jnp.maximum(a1 @ w + b[None, :] + a2, 0.0)

    # ---- module-spec shapes (batch=1): small-batch fast path --------------
    x1 = jax.random.normal(k_x1, (1, IN_FEATURES), dtype=jnp.float32)
    x2 = jax.random.normal(k_x2, (1, OUT_FEATURES), dtype=jnp.float32)
    out = linear_add_relu(x1, w, b, x2)
    jax.block_until_ready(out)
    assert out.shape == (1, OUT_FEATURES)
    assert jnp.allclose(out, ref_fn(x1, x2), atol=1e-5, rtol=1e-5)

    # ---- small aligned batch, forced through the Pallas kernel ------------
    x1_s = jax.random.normal(k_b1, (16, IN_FEATURES), dtype=jnp.float32)
    x2_s = jax.random.normal(k_b2, (16, OUT_FEATURES), dtype=jnp.float32)
    out_s = linear_add_relu(x1_s, w, b, x2_s, use_pallas=True)
    jax.block_until_ready(out_s)
    assert out_s.shape == (16, OUT_FEATURES)
    assert jnp.allclose(out_s, ref_fn(x1_s, x2_s), atol=1e-5, rtol=1e-5)

    # ---- ragged larger batch: exercises tiling / partial final block ------
    B = 1030
    x1_l = jax.random.normal(k_b1, (B, IN_FEATURES), dtype=jnp.float32)
    x2_l = jax.random.normal(k_b2, (B, OUT_FEATURES), dtype=jnp.float32)
    out_l = linear_add_relu(x1_l, w, b, x2_l)
    jax.block_until_ready(out_l)
    assert out_l.shape == (B, OUT_FEATURES)
    assert jnp.allclose(out_l, ref_fn(x1_l, x2_l), atol=1e-4, rtol=1e-4)

    print("KERNEL_OK")
</pallas_src>

<mosaic_0001>
module attributes {stable_mosaic.version = 11 : i64} {
  func.func @_linear_add_relu_kernel(%arg0: i32, %arg1: memref<8x25xf32, #tpu.memory_space<vmem>>, %arg2: memref<25x16xf32, #tpu.memory_space<vmem>>, %arg3: memref<1x16xf32, #tpu.memory_space<vmem>>, %arg4: memref<8x16xf32, #tpu.memory_space<vmem>>, %arg5: memref<8x16xf32, #tpu.memory_space<vmem>>) attributes {dimension_semantics = [#tpu.dimension_semantics<parallel>], iteration_bounds = array<i64: 2>, scalar_prefetch = 0 : i64, scratch_operands = 0 : i64, tpu.core_type = #tpu.core_type<tc>, window_params = [{transform_indices = @transform_0, window_bounds = array<i64: 8, 25>}, {pipeline_mode = #tpu.pipeline_mode<synchronous>, transform_indices = @transform_1, window_bounds = array<i64: 25, 16>}, {pipeline_mode = #tpu.pipeline_mode<synchronous>, transform_indices = @transform_2, window_bounds = array<i64: 1, 16>}, {transform_indices = @transform_3, window_bounds = array<i64: 8, 16>}, {transform_indices = @transform_4, window_bounds = array<i64: 8, 16>}]} {
    %c0 = arith.constant 0 : index
    %c0_0 = arith.constant 0 : index
    %0 = vector.load %arg1[%c0, %c0_0] : memref<8x25xf32, #tpu.memory_space<vmem>>, vector<8x25xf32>
    %c0_1 = arith.constant 0 : index
    %c0_2 = arith.constant 0 : index
    %1 = vector.load %arg2[%c0_1, %c0_2] : memref<25x16xf32, #tpu.memory_space<vmem>>, vector<25x16xf32>
    %cst = arith.constant dense<0.000000e+00> : vector<8x16xf32>
    %2 = tpu.matmul %0, %1, %cst {dimension_numbers = #tpu.dot_dimension_numbers<[1], [0], [0], [1], [0, 0, 1, 1], [], []>} : vector<8x25xf32>, vector<25x16xf32>, vector<8x16xf32> -> vector<8x16xf32>
    %c0_3 = arith.constant 0 : index
    %c0_4 = arith.constant 0 : index
    %3 = vector.load %arg3[%c0_3, %c0_4] : memref<1x16xf32, #tpu.memory_space<vmem>>, vector<1x16xf32>
    %4 = vector.broadcast %3 : vector<1x16xf32> to vector<8x16xf32>
    %5 = arith.addf %2, %4 : vector<8x16xf32>
    %c0_5 = arith.constant 0 : index
    %c0_6 = arith.constant 0 : index
    %6 = vector.load %arg4[%c0_5, %c0_6] : memref<8x16xf32, #tpu.memory_space<vmem>>, vector<8x16xf32>
    %7 = arith.addf %5, %6 : vector<8x16xf32>
    %cst_7 = arith.constant 0.000000e+00 : f32
    %8 = vector.broadcast %cst_7 : f32 to vector<8x16xf32>
    %9 = arith.maximumf %7, %8 : vector<8x16xf32>
    %c0_8 = arith.constant 0 : index
    %c0_9 = arith.constant 0 : index
    %10 = vector.load %arg5[%c0_8, %c0_9] : memref<8x16xf32, #tpu.memory_space<vmem>>, vector<8x16xf32>
    tpu.vector_store %arg5[%c0_8, %c0_9], %9 {strides = array<i32>} : memref<8x16xf32, #tpu.memory_space<vmem>>, vector<8x16xf32>,
    return
  }
  func.func @transform_0(%arg0: i32) -> (i32, i32) {
    %c0_i32 = arith.constant 0 : i32
    %c0_i32_0 = arith.constant 0 : i32
    return %arg0, %c0_i32 : i32, i32
  }
  func.func @transform_1(%arg0: i32) -> (i32, i32) {
    %c0_i32 = arith.constant 0 : i32
    %c0_i32_0 = arith.constant 0 : i32
    %c0_i32_1 = arith.constant 0 : i32
    return %c0_i32, %c0_i32_0 : i32, i32
  }
  func.func @transform_2(%arg0: i32) -> (i32, i32) {
    %c0_i32 = arith.constant 0 : i32
    %c0_i32_0 = arith.constant 0 : i32
    %c0_i32_1 = arith.constant 0 : i32
    return %c0_i32, %c0_i32_0 : i32, i32
  }
  func.func @transform_3(%arg0: i32) -> (i32, i32) {
    %c0_i32 = arith.constant 0 : i32
    %c0_i32_0 = arith.constant 0 : i32
    return %arg0, %c0_i32 : i32, i32
  }
  func.func @transform_4(%arg0: i32) -> (i32, i32) {
    %c0_i32 = arith.constant 0 : i32
    %c0_i32_0 = arith.constant 0 : i32
    return %arg0, %c0_i32 : i32, i32
  }
}

</mosaic_0001>

<bundles_post_ra>
// kernel: tpu_custom_call.1
= control target key start
LH: loop header
LB: loop body
LE: loop exit
PB: predicated region body
PF: predicated region fallthrough
CT: control target
= control target key end

     0   :  { %9 = vsyncpa [#allocation3], 0  ;;  %s682_s0 = inlined_call_operand.vmem [shape: f32[16,25], index: 0, kind: input, shape index: {}]   ;;  %s683_s1 = inlined_call_operand.vmem [shape: f32[25,16], index: 1, kind: input, shape index: {}]   ;;  %s684_s2 = inlined_call_operand.vmem [shape: f32[1,16], index: 2, kind: input, shape index: {}]   ;;  %s685_s3 = inlined_call_operand.vmem [shape: f32[16,16], index: 3, kind: input, shape index: {}]   ;;  %s686_s4 = inlined_call_operand.hbm [shape: f32[16,16], index: 4, kind: output, shape index: {}]  }
   0x1   :  { %11 = vsyncpa [#allocation3 + $0x1], 0  ;;  %s564_s15 = smov 0   ;;  %s566_s16 = smov 0  }
   0x2   :  { %s568_s17 = smov 0   ;;  %s570_s18 = smov 0  }
   0x3 LB: > { %s585_s19 = sadd.s32 4294967295, %s532_s18   ;;  %s390_s20 = sadd.s32 4294967294, %s532_s18   ;;  %s532_s18 = sphi %s570_s18, %s692_s18   ;;  %s528_s17 = sphi %s568_s17, %s691_s17   ;;  %s524_s16 = sphi %s566_s16, %s690_s16   ;;  %s520_s15 = sphi %s564_s15, %s689_s15  }
   0x4   : > { %s589_s21 = sadd.s32 1, %s532_s18   ;;  %s118_s22 = sadd.s32 1, %s528_s17 }
   0x5   : > { %s115_s23 = ssub.s32 %s532_s18, %s589_s21  ;;  %p128_p0 = scmp.ne.s32.totalorder %s528_s17, %s524_s16 }
   0x6   : > { %p116_p1 = scmp.eq.s32.totalorder %s115_s23, 0  ;;  %p129_p2 = scmp.eq.s32.totalorder %s585_s19, 1 }
   0x7   : > { %p134_p3 = scmp.ne.s32.totalorder %s524_s16, %s520_s15  ;;  %p135_p4 = scmp.eq.s32.totalorder %s390_s20, 1 }
   0x8   : > { %s600_s24 = scalar_select %p116_p1, %s528_s17, %s118_s22  }
   0x9   : > { %p602_p5 = por %p129_p2, %p128_p0  ;;  %p606_p6 = por %p135_p4, %p134_p3 }
   0xa   : > { %p393_p7 = scmp.ge.s32.totalorder %s532_s18, 1  ;;  %p173_p8 = scmp.lt.s32.totalorder %s532_s18, 3 }
   0xc   : > { %p174_p9 = pnand %p393_p7, %p173_p8 }
   0xd   : > { %v211_v0 = vld [vmem:[%s683_s1] sm:$0xff] (!%p174_p9)  ;;  %v212_v1 = vld [vmem:[%s683_s1 + $0x8] sm:$0xff] (!%p174_p9)  ;;  %v213_v2 = vld [vmem:[%s683_s1 + $0x10] sm:$0xff] (!%p174_p9)  ;;  %vm226_vm0 = vcmask (!%p174_p9), 1040384   ;;  %v534_v3 = vmov (!%p174_p9), 0.0|0.0   ;;  %p202_p10 = scmp.lt.s32.totalorder (!%p174_p9), %s585_s19, 1 }
   0xe   : > { %177 = sbr.rel (%p174_p9) target bundleno = 258 (0x102), region = 36  ;;  %420 = vmatprep.subr.bf16.mxu0 (!%p174_p9), %v534_v3  ;;  %v421_v4 = vpack.c.bf16 (!%p174_p9), %v212_v1, %v211_v0  ;;  %v214_v5 = vld [vmem:[%s683_s1 + $0x18] sm:$0x1] (!%p174_p9)  ;;  %vm535_vm1 = vmmov (!%p174_p9), 0   ;;  %v536_v6 = vmov (!%p174_p9), 0.0   ;;  %vm537_vm2 = vmmov (!%p174_p9), 1  }
   0xf   : > { %417 = vmatprep.mubr.msk.f32.mxu0 (!%p174_p9), %vm535_vm1, %v536_v6  ;;  %v424_v7 = vpack.c.bf16 (!%p174_p9), %v214_v5, %v213_v2  ;;  %vm425_vm3 = vmpackc.low (!%p174_p9), %vm226_vm0, %vm537_vm2  ;;  %vm222_vm4 = vcmask (!%p174_p9), 203776   ;;  %s199_s14 = sand.u32 (!%p174_p9), 1, %s524_s16   ;;  %v397_v9 = vld [vmem:[%s684_s2] ss:$0 sm:$0xff] (!%p174_p9)  ;;  %s401_s30 = sshll.u32 (!%p174_p9), %s585_s19, 7  ;;  %vm303_vm5 = vcmask (!%p174_p9), 130048  }
  0x10   : > { %422 = vmatpush3.bf16.msra.mxu0 (!%p174_p9), %v421_v4  ;;  %s394_s20 = sshll.u32 (!%p174_p9), %s199_s14, 3 }
  0x11   : > { %423 = vmatprep.subr.bf16.mxu0 (!%p174_p9), %v534_v3  ;;  %s201_s5 = scalar_lea.vmem (!%p174_p9), [#allocation2], %s394_s20 }
  0x12   : > { %s319_s6 = sshll.u32 (!%p174_p9), %s201_s5, 4  ;;  %s642_s6 = int_to_ptr.vmem [resolvable:$true] %s319_s6 }
  0x13   : > { %s470_s11 = scalar_lea.vmem (!%p174_p9), %s642_s6, 128 }
  0x14   : > { %426 = vmatpush3.bf16.msk.msra.mxu0 (!%p174_p9), %vm425_vm3, %v424_v7  ;;  %p471_p11 = scmp.ne.s32.totalorder (!%p174_p9), %s642_s6, %s470_s11 }
  0x15   : > { %s203_s9 = scalar_select %p202_p10, %s585_s19, 1 }
  0x16   : > { %p472_p12 = pnand %p471_p11, %p602_p5  ;;  %s538_s19 = smov [#allocation2]  }
  0x17   : > { %s395_s10 = sshll.u32 %s203_s9, 3  ;;  %s640_s9 = scalar_lea.hbm %s686_s4, %s401_s30 }
  0x18   : > { %s205_s13 = scalar_lea.vmem %s682_s0, %s395_s10  ;;  %s209_s27 = scalar_lea.vmem %s685_s3, %s395_s10 }
  0x19   : > { %v210_v8 = vld [vmem:[%s205_s13] sm:$0xff]  ;;  %s306_s10 = scalar_lea.sflag [#allocation3], %s199_s14  ;;  %p473_p13 = pneg %p472_p12 }
  0x1a   : > { %418 = vmatmul.mubr.msk.f32.vlgmr.msra.gmra.mrb[0].mxu0 %vm222_vm4, %v210_v8  ;;  %v300_v11 = vld [vmem:[%s209_s27] sm:$0xff]  ;;  %s474_s12 = sshll.u32 %s538_s19, 4  ;;  %s475_s12 = int_to_ptr.vmem [resolvable:$false] %s474_s12 }
  0x1b   : > { %s476_s13 = scalar_lea.vmem %s475_s12, 256  ;;  %p477_p0 = scmp.lt.s32.totalorder %s642_s6, %s475_s12 }
  0x1c   : > { %p478_p1 = scmp.lt.s32.totalorder %s476_s13, %s470_s11 }
  0x1e   : > { %p479_p2 = por %p478_p1, %p477_p0 }
  0x20   : > { %p480_p3 = pnand %p479_p2, %p473_p13 }
  0xed   : > { %v296_v10 = vpop.f32.mrb[0].mxu0 }
  0xee   : > { %v297_v12 = vadd.f32 %v397_v9, %v296_v10  ;;  %v419_v13 = vpop.f32.mrb[1].mxu0 }
  0xf0   : > { %v301_v14 = vadd.f32 %v300_v11, %v297_v12 }
  0xf2   : > { %v302_v15 = vmax.f32 %v301_v14, 0.0 }
  0xf4   : > { %304 = vst.msk [vmem:[%s201_s5] sm:$0xff] %vm303_vm5, %v302_v15 }
  0xf5   : > { %483 = shalt.err (!%p480_p3)
}
  0xf6   : > { %s484_s14 = scalar_lea.hbm %s640_s9, 128  ;;  %s488_s23 = scalar_lea.hbm %s686_s4, 256 }
  0xf7   : > { %p485_p4 = scmp.ne.s32.totalorder %s640_s9, %s484_s14  ;;  %p489_p9 = scmp.lt.u32.totalorder %s640_s9, %s686_s4 }
  0xf8   : > { %p490_p10 = scmp.lt.u32.totalorder %s488_s23, %s484_s14  ;;  %p492_p12 = scmp.lt.u32.totalorder %s484_s14, %s640_s9 }
  0xf9   : > { %p486_p7 = pnand %p485_p4, %p602_p5 }
  0xfa   : > { %p491_p11 = por %p490_p10, %p489_p9 }
  0xfb   : > { %p487_p8 = pneg %p486_p7 }
  0xfc   : > { %p493_p13 = por %p492_p12, %p491_p11 }
  0xfe   : > { %p494_p0 = pnand %p493_p13, %p487_p8 }
 0x100   : > { %497 = shalt.err (!%p494_p0)
}
 0x101   : > { %427 = dma.vmem_to_hbm [thread:$0]  (%p602_p5), %s642_s6, 128, %s640_s9, %s306_s10  }
 0x102 PF: > { %p433_p1 = scmp.ge.s32.totalorder %s532_s18, 2  ;;  %s331_s29 = sand.u32 1, %s520_s15  }
 0x103   : > { %s332_s30 = scalar_lea.sflag [#allocation3], %s331_s29 }
 0x104   : > { %p430_p2 = pnand %p433_p1, %p606_p6 }
 0x106   : > { %515 = dma.done.wait (!%p430_p2), %s332_s30, 128  }
 0x107   : > { %517 = vsyncadd (!%p430_p2), %s332_s30, 4294967168  ;;  %p14_p3 = scmp.ge.s32.totalorder %s589_s21, 4   ;;  %s689_s15 = smov %s524_s16 }
 0x108   : > { %s690_s16 = smov %s528_s17  ;;  %s691_s17 = smov %s600_s24 }
 0x109   : > { %s692_s18 = smov %s589_s21  ;;  %16 = sbr.rel (!%p14_p3) target bundleno = 3 (0x3), region = 74 }
 0x110   :  { %337 = vsyncpa [#allocation3], 1 }
 0x111   :  { %339 = vsyncpa [#allocation3 + $0x1], 1 }

</bundles_post_ra>
